<compile_context>
chip_gen: v7x
topology: tpu7x:2x2x1
jax: 0.10.0
libtpu: 0.0.40
codegen_flags: <defaults>
</compile_context>

<pallas_src>
import functools

import jax
import jax.numpy as jnp
import numpy as np
from jax.experimental import pallas as pl
from jax.experimental.pallas import tpu as pltpu


def _vmem_capacity_bytes() -> int:
    """Physical per-core VMEM; falls back to the smallest (v7x, 64 MiB)."""
    try:
        info = pltpu.get_tpu_info()
        cap = getattr(info, "vmem_capacity_bytes", None)
        if cap:
            return int(cap)
    except Exception:
        pass
    return 64 * 1024 * 1024


def _greedy_ctc_kernel(bnd_ref, em_ref, out_ref, *, blank: int):
    # bnd_ref: SMEM int32[(n_tiles,)]; bnd_ref[i] = argmax of the last row of
    # tile i-1 (-1 for tile 0).  Lets every tile dedup independently.
    em_t = jnp.transpose(em_ref[...])                      # (L, tile_t), XLU
    num_label, tile_t = em_t.shape

    # ---- argmax over labels (sublane axis), first-index tie-break ----------
    col_max = jnp.max(em_t, axis=0, keepdims=True)          # (1, tile_t)
    sub_iota = jax.lax.broadcasted_iota(jnp.int32, em_t.shape, 0)
    idx = jnp.min(
        jnp.where(em_t == col_max, sub_iota, jnp.int32(num_label)),
        axis=0, keepdims=True).astype(jnp.int32)            # (1, tile_t)
    idx = jnp.minimum(idx, jnp.int32(num_label - 1))         # all-NaN guard

    # ---- unique_consecutive + blank removal (cross-tile via prefetch) ------
    lane_iota = jax.lax.broadcasted_iota(jnp.int32, (1, tile_t), 1)
    rolled = pltpu.roll(idx, shift=1, axis=1)                # prev within tile
    prev0 = bnd_ref[pl.program_id(0)]                        # prev tile's last
    prev = jnp.where(lane_iota == 0, prev0, rolled)
    keep = (idx != prev) & (idx != jnp.int32(blank))

    # Packed output: argmax index where kept, -1 where dropped.
    out_ref[...] = jnp.where(keep, idx, jnp.int32(-1))


def greedy_ctc_packed(emission: jax.Array, blank: int = 0,
                      tile_t: int | None = None) -> jax.Array:
    """Returns packed int32[T]: argmax index at kept positions, -1 elsewhere."""
    T, L = emission.shape
    itemsize = jnp.dtype(emission.dtype).itemsize

    # Generation-aware VMEM budget (v7x: 64 MiB physical -> ~32 MiB of blocks,
    # limit 48 MiB; v5e/v6e: 128 MiB -> ~48 MiB of blocks, limit ~96 MiB).
    vmem_cap = _vmem_capacity_bytes()
    block_budget = min(vmem_cap // 2, 48 * 1024 * 1024)
    vmem_limit = min(vmem_cap * 3 // 4, 100 * 1024 * 1024)

    if tile_t is None:
        lane_pad_l = pl.cdiv(L, 128) * 128
        bytes_in = lane_pad_l * itemsize          # lane-padded input row
        # Conservative per-time-step VMEM: double-buffered input block + one
        # loaded copy (lane-padded) + transposed (L, t) copy + intermediates.
        per_t = 3 * bytes_in + L * itemsize + 256
        tile_t = max(128, (block_budget // per_t) // 128 * 128)
    else:
        tile_t = max(128, pl.cdiv(tile_t, 128) * 128)
    tile_t = min(tile_t, pl.cdiv(T, 128) * 128)   # never bigger than needed
    n_tiles = pl.cdiv(T, tile_t)

    # Cross-tile dedup boundaries: argmax of the last row of each preceding
    # tile.  Tiny strided gather + argmax on the XLA side (n_tiles rows of L),
    # scalar-prefetched to SMEM -> the grid can run fully parallel.
    if n_tiles > 1:
        prev_rows = emission[tile_t - 1::tile_t][: n_tiles - 1]   # (n_tiles-1, L)
        b_idx = jnp.argmax(prev_rows, axis=-1).astype(jnp.int32)
        boundary = jnp.concatenate([jnp.full((1,), -1, jnp.int32), b_idx])
    else:
        boundary = jnp.full((1,), -1, jnp.int32)

    kernel = functools.partial(_greedy_ctc_kernel, blank=blank)
    packed = pl.pallas_call(
        kernel,
        out_shape=jax.ShapeDtypeStruct((1, T), jnp.int32),
        grid_spec=pltpu.PrefetchScalarGridSpec(
            num_scalar_prefetch=1,
            grid=(n_tiles,),
            # Natural (T, L) layout: contiguous HBM blocks, no XLA pre-copy.
            in_specs=[pl.BlockSpec((tile_t, L), lambda i, bnd: (i, 0))],
            # Lane-dense packed output row.
            out_specs=pl.BlockSpec((1, tile_t), lambda i, bnd: (0, i)),
        ),
        compiler_params=pltpu.CompilerParams(
            # No serial carry -> time tiles are independent (megacore on v7x).
            dimension_semantics=("parallel",),
            vmem_limit_bytes=int(vmem_limit),
        ),
    )(boundary, emission)
    return packed[0]


def greedy_ctc_decode(emission: jax.Array, labels, blank: int = 0,
                      tile_t: int | None = None) -> str:
    """Full GreedyCTCDecoder.forward equivalent: returns the transcript."""
    packed = greedy_ctc_packed(emission, blank=blank, tile_t=tile_t)
    packed_h = np.asarray(jax.device_get(packed))
    # TODO(synk): the variable-length filter + string join (str output) has no
    # Pallas equivalent; done host-side as in the original module.
    return "".join(labels[int(i)] for i in packed_h[packed_h >= 0])


def _ref_packed(em_np: np.ndarray, blank: int) -> np.ndarray:
    idx = np.argmax(em_np, axis=-1).astype(np.int32)
    out = np.full_like(idx, -1)
    for t in range(idx.shape[0]):
        if (t == 0 or idx[t] != idx[t - 1]) and idx[t] != blank:
            out[t] = idx[t]
    return out


if __name__ == "__main__":
    labels = ["-"] + list("abcdefghijklmnopqrstuvwxyz") + ["|", "'", ".", ",", " "]
    blank = 0
    num_label = len(labels)                               # 32
    key = jax.random.PRNGKey(0)
    k1, k2 = jax.random.split(key)

    # --- case 1: demo-sized emission (T, L) = (16, 32), single ragged tile ---
    em1 = jax.random.normal(k1, (16, num_label), dtype=jnp.float32)
    packed1 = greedy_ctc_packed(em1, blank=blank)
    jax.block_until_ready(packed1)
    ref1 = _ref_packed(np.asarray(em1), blank)
    assert np.array_equal(np.asarray(packed1), ref1), (np.asarray(packed1), ref1)
    got_str1 = greedy_ctc_decode(em1, labels, blank=blank)
    ref_str1 = "".join(labels[int(i)] for i in ref1[ref1 >= 0])
    assert got_str1 == ref_str1, (got_str1, ref_str1)

    # --- case 2: multi-tile parallel grid (grid=3, tile_t=128) with repeated
    # argmaxes spanning the tile boundary -> exercises prefetched-boundary dedup.
    em2 = jax.random.normal(k2, (300, num_label), dtype=jnp.float32)
    em2 = em2.at[120:140, 5].set(25.0)
    packed2 = greedy_ctc_packed(em2, blank=blank, tile_t=128)
    jax.block_until_ready(packed2)
    ref2 = _ref_packed(np.asarray(em2), blank)
    assert np.array_equal(np.asarray(packed2), ref2), (np.asarray(packed2), ref2)
    got_str2 = greedy_ctc_decode(em2, labels, blank=blank, tile_t=128)
    ref_str2 = "".join(labels[int(i)] for i in ref2[ref2 >= 0])
    assert got_str2 == ref_str2, (got_str2, ref_str2)

    # --- case 3: same input through the default VMEM-derived tile (grid=1) ---
    packed3 = greedy_ctc_packed(em2, blank=blank)
    jax.block_until_ready(packed3)
    assert np.array_equal(np.asarray(packed3), ref2)

    print("KERNEL_OK")
</pallas_src>

<mosaic_0001>
module attributes {stable_mosaic.version = 11 : i64} {
  func.func @_greedy_ctc_kernel(%arg0: i32, %arg1: memref<1xi32, #tpu.memory_space<smem>>, %arg2: memref<128x32xf32, #tpu.memory_space<vmem>>, %arg3: memref<1x128xi32, #tpu.memory_space<vmem>>) attributes {dimension_semantics = [#tpu.dimension_semantics<parallel>], iteration_bounds = array<i64: 1>, scalar_prefetch = 1 : i64, scratch_operands = 0 : i64, tpu.core_type = #tpu.core_type<tc>, window_params = [{transform_indices = @transform_0, window_bounds = array<i64: 128, 32>}, {transform_indices = @transform_1, window_bounds = array<i64: 1, 128>}]} {
    %c0 = arith.constant 0 : index
    %c0_0 = arith.constant 0 : index
    %0 = vector.load %arg2[%c0, %c0_0] : memref<128x32xf32, #tpu.memory_space<vmem>>, vector<128x32xf32>
    %1 = tpu.transpose %0, [1, 0] : vector<128x32xf32> -> vector<32x128xf32>
    %cst = arith.constant dense<0xFF800000> : vector<128xf32>
    %2 = vector.multi_reduction <maximumf>, %1, %cst [0] : vector<32x128xf32> to vector<128xf32>
    %3 = vector.shape_cast %2 : vector<128xf32> to vector<1x128xf32>
    %4 = tpu.iota {dimensions = array<i32: 0>} : vector<32x128xi32>
    %5 = vector.broadcast %3 : vector<1x128xf32> to vector<32x128xf32>
    %6 = arith.cmpf oeq, %1, %5 : vector<32x128xf32>
    %c32_i32 = arith.constant 32 : i32
    %7 = vector.broadcast %c32_i32 : i32 to vector<32x128xi32>
    %8 = arith.select %6, %4, %7 : vector<32x128xi1>, vector<32x128xi32>
    %cst_1 = arith.constant dense<2147483647> : vector<128xi32>
    %9 = vector.multi_reduction <minsi>, %8, %cst_1 [0] : vector<32x128xi32> to vector<128xi32>
    %10 = vector.shape_cast %9 : vector<128xi32> to vector<1x128xi32>
    %c31_i32 = arith.constant 31 : i32
    %11 = vector.broadcast %c31_i32 : i32 to vector<1x128xi32>
    %12 = arith.minsi %10, %11 : vector<1x128xi32>
    %13 = tpu.iota {dimensions = array<i32: 1>} : vector<1x128xi32>
    %c1_i32 = arith.constant 1 : i32
    %14 = tpu.dynamic_rotate %12 by %c1_i32 dim 1 : vector<1x128xi32>, i32 -> vector<1x128xi32>
    %15 = arith.index_cast %arg0 : i32 to index
    %16 = memref.load %arg1[%15] : memref<1xi32, #tpu.memory_space<smem>>
    %c0_i32 = arith.constant 0 : i32
    %17 = vector.broadcast %c0_i32 : i32 to vector<1x128xi32>
    %18 = arith.cmpi eq, %13, %17 : vector<1x128xi32>
    %19 = vector.broadcast %16 : i32 to vector<1x128xi32>
    %20 = arith.select %18, %19, %14 : vector<1x128xi1>, vector<1x128xi32>
    %21 = arith.cmpi ne, %12, %20 : vector<1x128xi32>
    %c0_i32_2 = arith.constant 0 : i32
    %22 = vector.broadcast %c0_i32_2 : i32 to vector<1x128xi32>
    %23 = arith.cmpi ne, %12, %22 : vector<1x128xi32>
    %24 = arith.andi %21, %23 : vector<1x128xi1>
    %c-1_i32 = arith.constant -1 : i32
    %25 = vector.broadcast %c-1_i32 : i32 to vector<1x128xi32>
    %26 = arith.select %24, %12, %25 : vector<1x128xi1>, vector<1x128xi32>
    %c0_3 = arith.constant 0 : index
    %c0_4 = arith.constant 0 : index
    %27 = vector.load %arg3[%c0_3, %c0_4] : memref<1x128xi32, #tpu.memory_space<vmem>>, vector<1x128xi32>
    tpu.vector_store %arg3[%c0_3, %c0_4], %26 {strides = array<i32>} : memref<1x128xi32, #tpu.memory_space<vmem>>, vector<1x128xi32>,
    return
  }
  func.func @transform_0(%arg0: i32, %arg1: memref<1xi32, #tpu.memory_space<smem>>) -> (i32, i32) {
    %c0_i32 = arith.constant 0 : i32
    %c0_i32_0 = arith.constant 0 : i32
    return %arg0, %c0_i32 : i32, i32
  }
  func.func @transform_1(%arg0: i32, %arg1: memref<1xi32, #tpu.memory_space<smem>>) -> (i32, i32) {
    %c0_i32 = arith.constant 0 : i32
    %c0_i32_0 = arith.constant 0 : i32
    return %c0_i32, %arg0 : i32, i32
  }
}

</mosaic_0001>

<bundles_post_ra>
// kernel: tpu_custom_call.1
= control target key start
LH: loop header
LB: loop body
LE: loop exit
PB: predicated region body
PF: predicated region fallthrough
CT: control target
= control target key end

     0   :  { %8 = vsyncpa [#allocation5], 0  ;;  %s240_s0 = inlined_call_operand.<no memory space> [shape: s32[1], index: 0, kind: input, shape index: {}]   ;;  %s241_s1 = inlined_call_operand.hbm [shape: f32[16,32], index: 1, kind: input, shape index: {}]   ;;  %s242_s2 = inlined_call_operand.hbm [shape: s32[1,16], index: 2, kind: output, shape index: {}]  }
   0x1   :  { %9 = vsyncpa [#allocation6], 0 }
   0x2   :  { %14 = vsyncadd [#allocation5], 1792  ;;  %s193_s9 = smov [#allocation4]   ;;  %s145_s13 = scalar_lea.hbm %s241_s1, 256 }
   0x3   :  { %s15_s10 = sshll.u32 %s193_s9, 4  ;;  %p146_p0 = scmp.ne.s32.totalorder %s241_s1, %s145_s13  ;;  %s16_s10 = int_to_ptr.vmem [resolvable:$true] %s15_s10 }
   0x4   :  { %p149_p1 = scmp.lt.u32.totalorder %s145_s13, %s241_s1 }
   0x6   :  { %p151_p2 = pnand %p149_p1, %p146_p0 }
   0x8   :  { %154 = shalt.err (!%p151_p2)
}
   0x9   :  { %s155_s18 = scalar_lea.vmem %s16_s10, 256  ;;  %s159_s19 = scalar_lea.vmem %s16_s10, 2048 }
   0xa   :  { %p156_p3 = scmp.ne.s32.totalorder %s16_s10, %s155_s18  ;;  %p160_p4 = scmp.lt.s32.totalorder %s16_s10, %s16_s10 }
   0xb   :  { %p161_p5 = scmp.lt.s32.totalorder %s159_s19, %s155_s18 }
   0xd   :  { %p162_p6 = por %p161_p5, %p160_p4 }
   0xf   :  { %p163_p7 = pnand %p162_p6, %p156_p3 }
  0x11   :  { %166 = shalt.err (!%p163_p7)
}
  0x12   :  { %s194_s20 = smov 128   ;;  %s195_s21 = smov 8  }
  0x13   :  { %21 = dma.hbm_to_vmem [thread:$0]  %s241_s1, 256, %s16_s10, [#allocation5], %s194_s20, %s194_s20, %s195_s21  }
  0x14   :  { %189 = dma.done.wait [#allocation5], 2048  }
  0x15   :  { %190 = vsyncadd [#allocation5], 4294965248  ;;  %v25_v0 = vld [vmem:[#allocation4] sm:$0xff]  ;;  %v26_v1 = vld [vmem:[#allocation4 + $0x8] sm:$0xff]  ;;  %v82_v24 = vlaneseq  ;;  %s196_s1 = smov 1   ;;  %v118_v49 = vstv %s240_s0  ;;  %s197_s26 = smov [#allocation7]  }
  0x16   :  { %41 = vxpose.xlu0.b32.start [1/16] (narrow) %v25_v0, 32  ;;  %v27_v2 = vld [vmem:[#allocation4 + $0x10] sm:$0xff]  ;;  %v28_v3 = vld [vmem:[#allocation4 + $0x18] sm:$0xff]  ;;  %v29_v4 = vld [vmem:[#allocation4 + $0x20] sm:$0xff]  ;;  %s131_s27 = sshll.u32 %s197_s26, 4  ;;  %s132_s27 = int_to_ptr.vmem [resolvable:$true] %s131_s27 }
  0x17   :  { %v30_v5 = vld [vmem:[#allocation4 + $0x28] sm:$0xff]  ;;  %v31_v6 = vld [vmem:[#allocation4 + $0x30] sm:$0xff]  ;;  %v32_v7 = vld [vmem:[#allocation4 + $0x38] sm:$0xff]  ;;  %v83_v27 = vshrl.u32 %v82_v24, 7  ;;  %v113_v48 = vand.u32 127, %v82_v24  ;;  %s167_s28 = scalar_lea.vmem %s132_s27, 16  ;;  %p172_p9 = scmp.lt.s32.totalorder %s132_s27, %s132_s27 }
  0x18   :  { %v33_v8 = vld [vmem:[#allocation4 + $0x40] sm:$0xff]  ;;  %v34_v9 = vld [vmem:[#allocation4 + $0x48] sm:$0xff]  ;;  %v35_v10 = vld [vmem:[#allocation4 + $0x50] sm:$0xff]  ;;  %p168_p8 = scmp.ne.s32.totalorder %s132_s27, %s167_s28  ;;  %s171_s29 = scalar_lea.vmem %s132_s27, 32 }
  0x19   :  { %v36_v11 = vld [vmem:[#allocation4 + $0x58] sm:$0xff]  ;;  %v37_v12 = vld [vmem:[#allocation4 + $0x60] sm:$0xff]  ;;  %v38_v13 = vld [vmem:[#allocation4 + $0x68] sm:$0xff]  ;;  %v84_v30 = vadd.s32 8, %v83_v27  ;;  %v85_v31 = vadd.s32 16, %v83_v27  ;;  %v86_v32 = vadd.s32 24, %v83_v27  ;;  %p173_p10 = scmp.lt.s32.totalorder %s171_s29, %s167_s28 }
  0x1a   :  { %42 = vxpose.xlu0.b32.cont [2/16] (narrow) %v26_v1, 32  ;;  %v39_v14 = vld [vmem:[#allocation4 + $0x70] sm:$0xff]  ;;  %v40_v15 = vld [vmem:[#allocation4 + $0x78] sm:$0xff]  ;;  %vm117_vm11 = vcmp.eq.s32.totalorder %v113_v48, 0 }
  0x1b   :  { %p174_p11 = por %p173_p10, %p172_p9 }
  0x1d   :  { %p175_p12 = pnand %p174_p11, %p168_p8 }
  0x1e   :  { %43 = vxpose.xlu0.b32.cont [3/16] (narrow) %v27_v2, 32 }
  0x22   :  { %44 = vxpose.xlu0.b32.cont [4/16] (narrow) %v28_v3, 32 }
  0x26   :  { %45 = vxpose.xlu0.b32.cont [5/16] (narrow) %v29_v4, 32 }
  0x2a   :  { %46 = vxpose.xlu0.b32.cont [6/16] (narrow) %v30_v5, 32 }
  0x2e   :  { %47 = vxpose.xlu0.b32.cont [7/16] (narrow) %v31_v6, 32 }
  0x32   :  { %48 = vxpose.xlu0.b32.cont [8/16] (narrow) %v32_v7, 32 }
  0x36   :  { %49 = vxpose.xlu0.b32.cont [9/16] (narrow) %v33_v8, 32 }
  0x3a   :  { %50 = vxpose.xlu0.b32.cont [10/16] (narrow) %v34_v9, 32 }
  0x3e   :  { %51 = vxpose.xlu0.b32.cont [11/16] (narrow) %v35_v10, 32 }
  0x42   :  { %52 = vxpose.xlu0.b32.cont [12/16] (narrow) %v36_v11, 32 }
  0x46   :  { %53 = vxpose.xlu0.b32.cont [13/16] (narrow) %v37_v12, 32 }
  0x4a   :  { %54 = vxpose.xlu0.b32.cont [14/16] (narrow) %v38_v13, 32 }
  0x4e   :  { %55 = vxpose.xlu0.b32.cont [15/16] (narrow) %v39_v14, 32 }
  0x52   :  { %56 = vxpose.xlu0.b32.end [16/16] (narrow) %v40_v15, 32 }
  0x96   :  { %v57_v16 = vpop.trf.xlu0 }
  0x9a   :  { %v58_v17 = vpop.trf.xlu0 }
  0x9b   :  { %v73_v20 = vmax.f32 %v57_v16, %v58_v17 }
  0x9e   :  { %v59_v18 = vpop.trf.xlu0 }
  0xa2   :  { %v60_v19 = vpop.trf.xlu0 }
  0xa3   :  { %v74_v21 = vmax.f32 %v59_v18, %v60_v19 }
  0xa5   :  { %v75_v22 = vmax.f32 %v73_v20, %v74_v21 }
  0xa7   :  { %v76_v23 = vrot.slane %v75_v22, 4 }
  0xa9   :  { %v77_v25 = vmax.f32 %v75_v22, %v76_v23 }
  0xab   :  { %v78_v26 = vrot.slane %v77_v25, 2 }
  0xad   :  { %v79_v28 = vmax.f32 %v77_v25, %v78_v26 }
  0xaf   :  { %v80_v29 = vrot.slane %v79_v28, 1 }
  0xb1   :  { %v81_v33 = vmax.f32 %v79_v28, %v80_v29 }
  0xb3   :  { %vm87_vm0 = vcmp.eq.f32.partialorder %v57_v16, %v81_v33  ;;  %vm88_vm1 = vcmp.eq.f32.partialorder %v58_v17, %v81_v33  ;;  %vm89_vm2 = vcmp.eq.f32.partialorder %v59_v18, %v81_v33  ;;  %vm90_vm3 = vcmp.eq.f32.partialorder %v60_v19, %v81_v33 }
  0xb4   :  { %v91_v34 = vsel %vm87_vm0, %v83_v27, 32  ;;  %v92_v35 = vsel %vm88_vm1, %v84_v30, 32  ;;  %v93_v36 = vsel %vm89_vm2, %v85_v31, 32  ;;  %v94_v37 = vsel %vm90_vm3, %v86_v32, 32 }
  0xb5   :  { %vm95_vm4 = vcmp.lt.s32.totalorder %v91_v34, %v92_v35  ;;  %vm97_vm5 = vcmp.lt.s32.totalorder %v93_v36, %v94_v37 }
  0xb6   :  { %v96_v38 = vsel %vm95_vm4, %v91_v34, %v92_v35  ;;  %v98_v39 = vsel %vm97_vm5, %v93_v36, %v94_v37 }
  0xb7   :  { %vm99_vm6 = vcmp.lt.s32.totalorder %v96_v38, %v98_v39 }
  0xb8   :  { %v100_v40 = vsel %vm99_vm6, %v96_v38, %v98_v39 }
  0xb9   :  { %v101_v41 = vrot.slane %v100_v40, 4 }
  0xbb   :  { %vm102_vm7 = vcmp.lt.s32.totalorder %v100_v40, %v101_v41 }
  0xbc   :  { %v103_v42 = vsel %vm102_vm7, %v100_v40, %v101_v41 }
  0xbd   :  { %v104_v43 = vrot.slane %v103_v42, 2 }
  0xbf   :  { %vm105_vm8 = vcmp.lt.s32.totalorder %v103_v42, %v104_v43 }
  0xc0   :  { %v106_v44 = vsel %vm105_vm8, %v103_v42, %v104_v43 }
  0xc1   :  { %v107_v45 = vrot.slane %v106_v44, 1 }
  0xc3   :  { %vm108_vm9 = vcmp.lt.s32.totalorder %v106_v44, %v107_v45 }
  0xc4   :  { %v109_v46 = vsel %vm108_vm9, %v106_v44, %v107_v45 }
  0xc5   :  { %vm110_vm10 = vcmp.lt.s32.totalorder %v109_v46, 31 }
  0xc6   :  { %v111_v47 = vsel %vm110_vm10, %v109_v46, 31 }
  0xc7   :  { %114 = vrot.lane.b32.xlu1 %v111_v47, %s196_s1  ;;  %vm121_vm13 = vcmp.ne.s32.totalorder %v111_v47, 0 }
 0x139   :  { %v115_v50 = vpop.permute.xlu1 %114 }
 0x13a   :  { %v119_v51 = vsel %vm117_vm11, %v118_v49, %v115_v50 }
 0x13b   :  { %vm120_vm12 = vcmp.ne.s32.totalorder %v111_v47, %v119_v51 }
 0x13c   :  { %vm122_vm14 = vmand %vm120_vm12, %vm121_vm13 }
 0x13d   :  { %v123_v52 = vsel %vm122_vm14, %v111_v47, 4294967295 }
 0x13e   :  { %124 = vst [vmem:[#allocation7] sm:$0x1] %v123_v52 }
 0x13f   :  { %178 = shalt.err (!%p175_p12)
}
 0x140   :  { %s179_s3 = scalar_lea.hbm %s242_s2, 16 }
 0x141   :  { %p180_p13 = scmp.ne.s32.totalorder %s242_s2, %s179_s3  ;;  %p183_p0 = scmp.lt.u32.totalorder %s179_s3, %s242_s2 }
 0x143   :  { %p185_p1 = pnand %p183_p0, %p180_p13 }
 0x145   :  { %188 = shalt.err (!%p185_p1)
}
 0x146   :  { %134 = dma.vmem_to_hbm [thread:$0]  %s132_s27, 16, %s242_s2, [#allocation6]  }
 0x147   :  { %191 = dma.done.wait [#allocation6], 16  }
 0x148   :  { %192 = vsyncadd [#allocation6], 4294967280 }
 0x149   :  { %138 = vsyncpa [#allocation5], 1 }
 0x14a   :  { %139 = vsyncpa [#allocation6], 1 }

</bundles_post_ra>
